<compile_context>
chip_gen: v6e
topology: v6e:2x2x1
jax: 0.10.0
libtpu: 0.0.40
codegen_flags: <defaults>
</compile_context>

<pallas_src>
import functools

import jax
import jax.numpy as jnp
from jax.experimental import pallas as pl
from jax.experimental.pallas import tpu as pltpu


def _conv_out_len(L, k, stride, pad, dil):
    return (L + 2 * pad - dil * (k - 1) - 1) // stride + 1


def _round_up(a, m):
    return ((a + m - 1) // m) * m


def _temporal_block_kernel(*refs, K, ST, DIL, PAD, W1v, W2v, NBS2, tail,
                           has_downsample, separate_residual):
    """One grid step = NB batch elements, laid out along lanes in segments.

    Segment geometry (per batch element b within the step):
      xp slab  : padded x   at columns b*S0 + [0, L+2*PAD)
      h1       : conv1 out  at columns b*S1 + [0, L1)   (S0 = S1*ST)
      h2 / out : conv2 out  at columns b*S2 + [0, L2)   (S1 = S2*ST)
    Garbage columns between segments are masked to zero in h1 so they double as
    conv2's zero padding; output garbage columns are cropped wrapper-side.
    """
    i = 0
    xp_ref = refs[i]; i += 1          # (C_in, W0)   bf16
    mask_ref = refs[i]; i += 1        # (1, W1v)     f32 {0,1}
    xr_ref = None
    if separate_residual:
        xr_ref = refs[i]; i += 1      # (C_in, NBS2) bf16 or f32
    w1_ref = refs[i]                  # (K, C_out, C_in)  bf16
    b1_ref = refs[i + 1]              # (C_out, 1)        f32
    w2_ref = refs[i + 2]              # (K, C_out, C_out) bf16
    b2_ref = refs[i + 3]              # (C_out, 1)        f32
    i += 4
    if has_downsample:
        wd_ref = refs[i]              # (C_out, C_in) bf16
        bd_ref = refs[i + 1]          # (C_out, 1)    f32
        i += 2
    o_ref = refs[i]                   # (C_out, W2v) f32

    f32 = jnp.float32
    bf16 = jnp.bfloat16
    C_out = o_ref.shape[0]

    # ---------------- conv1: K per-tap 2-D MXU dots, f32 accumulation --------
    xp_val = None if ST == 1 else xp_ref[...]
    acc1 = None
    for t in range(K):
        if ST == 1:
            xt = xp_ref[:, pl.ds(t * DIL, W1v)]
        else:
            xt = xp_val[:, t * DIL: t * DIL + (W1v - 1) * ST + 1: ST]
        d = jnp.dot(w1_ref[t], xt, preferred_element_type=f32)
        acc1 = d if acc1 is None else acc1 + d
    h1 = jnp.maximum(acc1 + b1_ref[...], 0.0)
    # Zero the inter-segment garbage so it acts as conv2's zero padding; single
    # bf16 cast here is the only extra copy (no VMEM scratch round trip).
    h1 = jnp.where(mask_ref[...] > 0.5, h1, 0.0).astype(bf16)
    # dropout1: identity in eval mode

    # slab = [PAD zeros | h1 | tail zeros]  -> conv2 reads it with shifted slices
    pieces = []
    if PAD > 0:
        pieces.append(jnp.zeros((C_out, PAD), bf16))
    pieces.append(h1)
    if tail > 0:
        pieces.append(jnp.zeros((C_out, tail), bf16))
    slab = pieces[0] if len(pieces) == 1 else jnp.concatenate(pieces, axis=1)

    # ---------------- conv2: K per-tap 2-D MXU dots over the slab ------------
    acc2 = None
    for t in range(K):
        if ST == 1:
            st = slab[:, t * DIL: t * DIL + W2v]
        else:
            st = slab[:, t * DIL: t * DIL + (W2v - 1) * ST + 1: ST]
        d = jnp.dot(w2_ref[t], st, preferred_element_type=f32)
        acc2 = d if acc2 is None else acc2 + d
    h2 = jnp.maximum(acc2 + b2_ref[...], 0.0)
    # dropout2: identity in eval mode

    # ---------------- residual path ------------------------------------------
    if has_downsample:
        if separate_residual:
            xres = xr_ref[...]
        else:
            # stride==1: residual input is a slice of the same xp slab.
            xres = xp_ref[:, pl.ds(PAD, NBS2)]
        res = jnp.dot(wd_ref[...], xres, preferred_element_type=f32) + bd_ref[...]
    else:
        # identity skip: exact float32 copy of x (no bf16 rounding on the skip).
        res = xr_ref[...].astype(f32)
    if W2v > NBS2:
        res = jnp.concatenate(
            [res, jnp.zeros((C_out, W2v - NBS2), f32)], axis=1)

    # ---------------- add + final ReLU, lane-dense store ---------------------
    o_ref[...] = jnp.maximum(h2 + res, 0.0).astype(o_ref.dtype)


def temporal_block(x, params, *, kernel_size, stride, dilation, padding,
                   block_batch=None):
    """x: (N, C_in, L) float32.  params = (w1, b1, w2, b2, wd, bd).

    wd: (C_out, C_in) or None (None => identity residual, exact f32 skip path).
    """
    w1, b1, w2, b2, wd, bd = params
    N, C_in, L = x.shape
    C_out = w1.shape[0]
    K, ST, DIL, PAD = kernel_size, stride, dilation, padding
    has_downsample = wd is not None

    Lp = L + 2 * PAD
    L1 = _conv_out_len(L, K, ST, PAD, DIL)
    L2 = _conv_out_len(L1, K, ST, PAD, DIL)
    LM = min(L2, L)                           # crop length of the residual sum

    # Segment strides of the lane-folded layout: S0 = S1*ST = S2*ST*ST.
    S2 = max(LM, -(-(L1 + PAD) // ST), -(-Lp // (ST * ST)))
    S1 = S2 * ST
    S0 = S1 * ST

    separate_residual = (not has_downsample) or (ST != 1)

    # ---- batch elements per grid step (NB): fill VMEM, keep >= 2 grid steps --
    if block_batch is None:
        bytes_per_b = (2 * C_in * S0 * 2                     # xp bf16, dbl-buffered
                       + 2 * C_out * S2 * 4                  # out f32, dbl-buffered
                       + (2 * C_in * S2 * 4 if separate_residual else 0)
                       + 4 * C_out * (S1 + S2) * 4)          # in-register working set
        budget = 20 * (1 << 20)                              # safe on v5e/v6e/v7x
        cap = max(1, budget // max(bytes_per_b, 1))
        hard = N // 2 if N >= 2 else 1                       # >=2 steps -> both v7x TCs
        desired = max(1, min(cap, hard))
        NB = max(d for d in range(1, N + 1) if N % d == 0 and d <= desired)
    else:
        NB = block_batch
        assert N % NB == 0
    G = N // NB

    W1v = NB * S1                                   # conv1 output width per step
    NBS2 = NB * S2
    W2v = _round_up(NBS2, 128)                      # lane-dense output slab width
    # xp slab width: conv1 tap reads (+ residual-reuse slice for stride==1).
    need0 = (W1v - 1) * ST + (K - 1) * DIL + 1
    if has_downsample and not separate_residual:
        need0 = max(need0, PAD + NBS2)
    W0 = _round_up(max(need0, NB * S0), 128)
    # h1 slab tail so conv2 tap slices of width W2v stay in-bounds.
    tail = max(0, (W2v - 1) * ST + (K - 1) * DIL + 1 - (PAD + W1v))

    # ---- wrapper-side layout plumbing (cheap XLA data movement) --------------
    xpad = jnp.pad(x, ((0, 0), (0, 0), (PAD, PAD + (S0 - Lp))))        # (N,C_in,S0)
    xp = xpad.reshape(G, NB, C_in, S0).transpose(0, 2, 1, 3)
    xp = xp.reshape(G, C_in, NB * S0)
    xp = jnp.pad(xp, ((0, 0), (0, 0), (0, W0 - NB * S0))).astype(jnp.bfloat16)

    mask1 = (jnp.arange(W1v) % S1 < L1).astype(jnp.float32).reshape(1, W1v)

    args = [xp, mask1]
    in_specs = [
        pl.BlockSpec((None, C_in, W0), lambda g: (g, 0, 0)),      # padded x slab
        pl.BlockSpec((1, W1v), lambda g: (0, 0)),                 # h1 valid mask
    ]
    if separate_residual:
        xr_dtype = jnp.bfloat16 if has_downsample else jnp.float32
        xr = jnp.pad(x[:, :, :LM], ((0, 0), (0, 0), (0, S2 - LM)))   # (N,C_in,S2)
        xr = xr.reshape(G, NB, C_in, S2).transpose(0, 2, 1, 3)
        xr = xr.reshape(G, C_in, NBS2).astype(xr_dtype)
        args.append(xr)
        in_specs.append(pl.BlockSpec((None, C_in, NBS2), lambda g: (g, 0, 0)))

    w1k = jnp.transpose(w1, (2, 0, 1)).astype(jnp.bfloat16)       # (K,C_out,C_in)
    w2k = jnp.transpose(w2, (2, 0, 1)).astype(jnp.bfloat16)       # (K,C_out,C_out)
    b1c = b1.reshape(C_out, 1).astype(jnp.float32)
    b2c = b2.reshape(C_out, 1).astype(jnp.float32)
    args += [w1k, b1c, w2k, b2c]
    in_specs += [
        pl.BlockSpec((K, C_out, C_in), lambda g: (0, 0, 0)),
        pl.BlockSpec((C_out, 1), lambda g: (0, 0)),
        pl.BlockSpec((K, C_out, C_out), lambda g: (0, 0, 0)),
        pl.BlockSpec((C_out, 1), lambda g: (0, 0)),
    ]
    if has_downsample:
        wdc = wd.astype(jnp.bfloat16)
        bdc = bd.reshape(C_out, 1).astype(jnp.float32)
        args += [wdc, bdc]
        in_specs += [
            pl.BlockSpec((C_out, C_in), lambda g: (0, 0)),
            pl.BlockSpec((C_out, 1), lambda g: (0, 0)),
        ]

    kern = functools.partial(
        _temporal_block_kernel, K=K, ST=ST, DIL=DIL, PAD=PAD,
        W1v=W1v, W2v=W2v, NBS2=NBS2, tail=tail,
        has_downsample=has_downsample, separate_residual=separate_residual)

    out_slab = pl.pallas_call(
        kern,
        out_shape=jax.ShapeDtypeStruct((G, C_out, W2v), x.dtype),
        grid_spec=pltpu.PrefetchScalarGridSpec(
            num_scalar_prefetch=0,
            grid=(G,),
            in_specs=in_specs,
            out_specs=pl.BlockSpec((None, C_out, W2v), lambda g: (g, 0, 0)),
        ),
        compiler_params=pltpu.CompilerParams(
            dimension_semantics=("parallel",),
            vmem_limit_bytes=48 * (1 << 20)),
    )(*args)

    # Undo the lane-folded segment layout: (G, C_out, NB*S2) -> (N, C_out, LM).
    out = out_slab[:, :, :NBS2].reshape(G, C_out, NB, S2)
    out = out.transpose(0, 2, 1, 3).reshape(N, C_out, S2)
    return out[:, :, :LM]


def temporal_block_reference(x, params, *, kernel_size, stride, dilation, padding):
    """Pure-JAX reference using lax.conv_general_dilated (matches PyTorch eval)."""
    w1, b1, w2, b2, wd, bd = params
    dn = ("NCH", "OIH", "NCH")

    def conv(inp, w, b, st, pad, dil):
        y = jax.lax.conv_general_dilated(
            inp, w, window_strides=(st,), padding=[(pad, pad)],
            rhs_dilation=(dil,), dimension_numbers=dn)
        return y + b[None, :, None]

    out = jax.nn.relu(conv(x, w1, b1, stride, padding, dilation))
    out = jax.nn.relu(conv(out, w2, b2, stride, padding, dilation))
    res = x if wd is None else conv(x, wd[:, :, None], bd, 1, 0, 1)
    lm = min(out.shape[2], res.shape[2])
    return jax.nn.relu(out[:, :, :lm] + res[:, :, :lm])


if __name__ == "__main__":
    key = jax.random.PRNGKey(0)

    def make_params(kw, n_in, n_out, ks):
        k1, k2, kd, kb1, kb2, kbd = jax.random.split(kw, 6)
        w1 = 0.01 * jax.random.normal(k1, (n_out, n_in, ks), jnp.float32)
        w2 = 0.01 * jax.random.normal(k2, (n_out, n_out, ks), jnp.float32)
        b1 = 0.1 * jax.random.normal(kb1, (n_out,), jnp.float32)
        b2 = 0.1 * jax.random.normal(kb2, (n_out,), jnp.float32)
        if n_in != n_out:
            wd = 0.01 * jax.random.normal(kd, (n_out, n_in), jnp.float32)
            bd = 0.1 * jax.random.normal(kbd, (n_out,), jnp.float32)
        else:
            wd, bd = None, None                 # identity residual (res = x)
        return (w1, b1, w2, b2, wd, bd)

    cfg = dict(kernel_size=3, stride=1, dilation=2, padding=2)
    N, L = 2, 16
    kx1, kp1, kx2, kp2 = jax.random.split(key, 4)

    # Case 1: n_inputs != n_outputs -> 1x1 downsample conv on the skip path.
    x = jax.random.normal(kx1, (N, 4, L), dtype=jnp.float32)
    params = make_params(kp1, 4, 8, cfg["kernel_size"])
    out = jax.block_until_ready(temporal_block(x, params, **cfg))
    ref = temporal_block_reference(x, params, **cfg)
    assert out.shape == ref.shape, (out.shape, ref.shape)
    assert jnp.allclose(out, ref, rtol=2e-2, atol=2e-2), "mismatch (downsample case)"

    # Case 2: n_inputs == n_outputs -> exact f32 identity residual.
    x2 = jax.random.normal(kx2, (N, 8, L), dtype=jnp.float32)
    params2 = make_params(kp2, 8, 8, cfg["kernel_size"])
    out2 = jax.block_until_ready(temporal_block(x2, params2, **cfg))
    ref2 = temporal_block_reference(x2, params2, **cfg)
    assert out2.shape == ref2.shape, (out2.shape, ref2.shape)
    assert jnp.allclose(out2, ref2, rtol=2e-2, atol=2e-2), "mismatch (identity case)"

    print("KERNEL_OK")
</pallas_src>

<mosaic_0001>
module attributes {stable_mosaic.version = 11 : i64} {
  func.func @_temporal_block_kernel(%arg0: i32, %arg1: memref<1x4x128xbf16, #tpu.memory_space<vmem>>, %arg2: memref<1x20xf32, #tpu.memory_space<vmem>>, %arg3: memref<3x8x4xbf16, #tpu.memory_space<vmem>>, %arg4: memref<8x1xf32, #tpu.memory_space<vmem>>, %arg5: memref<3x8x8xbf16, #tpu.memory_space<vmem>>, %arg6: memref<8x1xf32, #tpu.memory_space<vmem>>, %arg7: memref<8x4xbf16, #tpu.memory_space<vmem>>, %arg8: memref<8x1xf32, #tpu.memory_space<vmem>>, %arg9: memref<1x8x128xf32, #tpu.memory_space<vmem>>) attributes {dimension_semantics = [#tpu.dimension_semantics<parallel>], iteration_bounds = array<i64: 2>, scalar_prefetch = 0 : i64, scratch_operands = 0 : i64, tpu.core_type = #tpu.core_type<tc>, window_params = [{transform_indices = @transform_0, window_bounds = array<i64: 1, 4, 128>}, {pipeline_mode = #tpu.pipeline_mode<synchronous>, transform_indices = @transform_1, window_bounds = array<i64: 1, 20>}, {pipeline_mode = #tpu.pipeline_mode<synchronous>, transform_indices = @transform_2, window_bounds = array<i64: 3, 8, 4>}, {pipeline_mode = #tpu.pipeline_mode<synchronous>, transform_indices = @transform_3, window_bounds = array<i64: 8, 1>}, {pipeline_mode = #tpu.pipeline_mode<synchronous>, transform_indices = @transform_4, window_bounds = array<i64: 3, 8, 8>}, {pipeline_mode = #tpu.pipeline_mode<synchronous>, transform_indices = @transform_5, window_bounds = array<i64: 8, 1>}, {pipeline_mode = #tpu.pipeline_mode<synchronous>, transform_indices = @transform_6, window_bounds = array<i64: 8, 4>}, {pipeline_mode = #tpu.pipeline_mode<synchronous>, transform_indices = @transform_7, window_bounds = array<i64: 8, 1>}, {transform_indices = @transform_8, window_bounds = array<i64: 1, 8, 128>}]} {
    %c0 = arith.constant 0 : index
    %c0_0 = arith.constant 0 : index
    %c0_1 = arith.constant 0 : index
    %0 = vector.load %arg1[%c0, %c0_0, %c0_1] : memref<1x4x128xbf16, #tpu.memory_space<vmem>>, vector<1x4x20xbf16>
    %1 = vector.shape_cast %0 : vector<1x4x20xbf16> to vector<4x20xbf16>
    %c0_2 = arith.constant 0 : index
    %c0_3 = arith.constant 0 : index
    %c0_4 = arith.constant 0 : index
    %2 = vector.load %arg3[%c0_2, %c0_3, %c0_4] : memref<3x8x4xbf16, #tpu.memory_space<vmem>>, vector<1x8x4xbf16>
    %3 = vector.shape_cast %2 : vector<1x8x4xbf16> to vector<8x4xbf16>
    %cst = arith.constant dense<0.000000e+00> : vector<8x20xf32>
    %4 = tpu.matmul %3, %1, %cst {dimension_numbers = #tpu.dot_dimension_numbers<[1], [0], [0], [1], [0, 0, 1, 1], [], []>} : vector<8x4xbf16>, vector<4x20xbf16>, vector<8x20xf32> -> vector<8x20xf32>
    %c0_5 = arith.constant 0 : index
    %c0_6 = arith.constant 0 : index
    %c2 = arith.constant 2 : index
    %5 = vector.load %arg1[%c0_5, %c0_6, %c2] : memref<1x4x128xbf16, #tpu.memory_space<vmem>>, vector<1x4x20xbf16>
    %6 = vector.shape_cast %5 : vector<1x4x20xbf16> to vector<4x20xbf16>
    %c1 = arith.constant 1 : index
    %c0_7 = arith.constant 0 : index
    %c0_8 = arith.constant 0 : index
    %7 = vector.load %arg3[%c1, %c0_7, %c0_8] : memref<3x8x4xbf16, #tpu.memory_space<vmem>>, vector<1x8x4xbf16>
    %8 = vector.shape_cast %7 : vector<1x8x4xbf16> to vector<8x4xbf16>
    %cst_9 = arith.constant dense<0.000000e+00> : vector<8x20xf32>
    %9 = tpu.matmul %8, %6, %cst_9 {dimension_numbers = #tpu.dot_dimension_numbers<[1], [0], [0], [1], [0, 0, 1, 1], [], []>} : vector<8x4xbf16>, vector<4x20xbf16>, vector<8x20xf32> -> vector<8x20xf32>
    %10 = arith.addf %4, %9 : vector<8x20xf32>
    %c0_10 = arith.constant 0 : index
    %c0_11 = arith.constant 0 : index
    %c4 = arith.constant 4 : index
    %11 = vector.load %arg1[%c0_10, %c0_11, %c4] : memref<1x4x128xbf16, #tpu.memory_space<vmem>>, vector<1x4x20xbf16>
    %12 = vector.shape_cast %11 : vector<1x4x20xbf16> to vector<4x20xbf16>
    %c2_12 = arith.constant 2 : index
    %c0_13 = arith.constant 0 : index
    %c0_14 = arith.constant 0 : index
    %13 = vector.load %arg3[%c2_12, %c0_13, %c0_14] : memref<3x8x4xbf16, #tpu.memory_space<vmem>>, vector<1x8x4xbf16>
    %14 = vector.shape_cast %13 : vector<1x8x4xbf16> to vector<8x4xbf16>
    %cst_15 = arith.constant dense<0.000000e+00> : vector<8x20xf32>
    %15 = tpu.matmul %14, %12, %cst_15 {dimension_numbers = #tpu.dot_dimension_numbers<[1], [0], [0], [1], [0, 0, 1, 1], [], []>} : vector<8x4xbf16>, vector<4x20xbf16>, vector<8x20xf32> -> vector<8x20xf32>
    %16 = arith.addf %10, %15 : vector<8x20xf32>
    %c0_16 = arith.constant 0 : index
    %c0_17 = arith.constant 0 : index
    %17 = vector.load %arg4[%c0_16, %c0_17] : memref<8x1xf32, #tpu.memory_space<vmem>>, vector<8x1xf32>
    %18 = vector.broadcast %17 : vector<8x1xf32> to vector<8x20xf32>
    %19 = arith.addf %16, %18 : vector<8x20xf32>
    %cst_18 = arith.constant 0.000000e+00 : f32
    %20 = vector.broadcast %cst_18 : f32 to vector<8x20xf32>
    %21 = arith.maximumf %19, %20 : vector<8x20xf32>
    %c0_19 = arith.constant 0 : index
    %c0_20 = arith.constant 0 : index
    %22 = vector.load %arg2[%c0_19, %c0_20] : memref<1x20xf32, #tpu.memory_space<vmem>>, vector<1x20xf32>
    %cst_21 = arith.constant 5.000000e-01 : f32
    %23 = vector.broadcast %cst_21 : f32 to vector<1x20xf32>
    %24 = arith.cmpf ogt, %22, %23 : vector<1x20xf32>
    %cst_22 = arith.constant 0.000000e+00 : f32
    %25 = vector.shape_cast %24 : vector<1x20xi1> to vector<1x20xi1>
    %26 = vector.broadcast %25 : vector<1x20xi1> to vector<8x20xi1>
    %27 = vector.broadcast %cst_22 : f32 to vector<8x20xf32>
    %28 = arith.select %26, %21, %27 : vector<8x20xi1>, vector<8x20xf32>
    %29 = arith.truncf %28 : vector<8x20xf32> to vector<8x20xbf16>
    %cst_23 = arith.constant 0.000000e+00 : bf16
    %30 = vector.broadcast %cst_23 : bf16 to vector<8x2xbf16>
    %cst_24 = arith.constant 0.000000e+00 : bf16
    %31 = vector.broadcast %cst_24 : bf16 to vector<8x110xbf16>
    %32 = tpu.concatenate %30, %29, %31 in 1 : vector<8x2xbf16>, vector<8x20xbf16>, vector<8x110xbf16> -> vector<8x132xbf16>
    %33 = vector.extract_strided_slice %32 {offsets = [0, 0], sizes = [8, 128], strides = [1, 1]} : vector<8x132xbf16> to vector<8x128xbf16>
    %c0_25 = arith.constant 0 : index
    %c0_26 = arith.constant 0 : index
    %c0_27 = arith.constant 0 : index
    %34 = vector.load %arg5[%c0_25, %c0_26, %c0_27] : memref<3x8x8xbf16, #tpu.memory_space<vmem>>, vector<1x8x8xbf16>
    %35 = vector.shape_cast %34 : vector<1x8x8xbf16> to vector<8x8xbf16>
    %cst_28 = arith.constant dense<0.000000e+00> : vector<8x128xf32>
    %36 = tpu.matmul %35, %33, %cst_28 {dimension_numbers = #tpu.dot_dimension_numbers<[1], [0], [0], [1], [0, 0, 1, 1], [], []>} : vector<8x8xbf16>, vector<8x128xbf16>, vector<8x128xf32> -> vector<8x128xf32>
    %37 = vector.extract_strided_slice %32 {offsets = [0, 2], sizes = [8, 128], strides = [1, 1]} : vector<8x132xbf16> to vector<8x128xbf16>
    %c1_29 = arith.constant 1 : index
    %c0_30 = arith.constant 0 : index
    %c0_31 = arith.constant 0 : index
    %38 = vector.load %arg5[%c1_29, %c0_30, %c0_31] : memref<3x8x8xbf16, #tpu.memory_space<vmem>>, vector<1x8x8xbf16>
    %39 = vector.shape_cast %38 : vector<1x8x8xbf16> to vector<8x8xbf16>
    %cst_32 = arith.constant dense<0.000000e+00> : vector<8x128xf32>
    %40 = tpu.matmul %39, %37, %cst_32 {dimension_numbers = #tpu.dot_dimension_numbers<[1], [0], [0], [1], [0, 0, 1, 1], [], []>} : vector<8x8xbf16>, vector<8x128xbf16>, vector<8x128xf32> -> vector<8x128xf32>
    %41 = arith.addf %36, %40 : vector<8x128xf32>
    %42 = vector.extract_strided_slice %32 {offsets = [0, 4], sizes = [8, 128], strides = [1, 1]} : vector<8x132xbf16> to vector<8x128xbf16>
    %c2_33 = arith.constant 2 : index
    %c0_34 = arith.constant 0 : index
    %c0_35 = arith.constant 0 : index
    %43 = vector.load %arg5[%c2_33, %c0_34, %c0_35] : memref<3x8x8xbf16, #tpu.memory_space<vmem>>, vector<1x8x8xbf16>
    %44 = vector.shape_cast %43 : vector<1x8x8xbf16> to vector<8x8xbf16>
    %cst_36 = arith.constant dense<0.000000e+00> : vector<8x128xf32>
    %45 = tpu.matmul %44, %42, %cst_36 {dimension_numbers = #tpu.dot_dimension_numbers<[1], [0], [0], [1], [0, 0, 1, 1], [], []>} : vector<8x8xbf16>, vector<8x128xbf16>, vector<8x128xf32> -> vector<8x128xf32>
    %46 = arith.addf %41, %45 : vector<8x128xf32>
    %c0_37 = arith.constant 0 : index
    %c0_38 = arith.constant 0 : index
    %47 = vector.load %arg6[%c0_37, %c0_38] : memref<8x1xf32, #tpu.memory_space<vmem>>, vector<8x1xf32>
    %48 = vector.broadcast %47 : vector<8x1xf32> to vector<8x128xf32>
    %49 = arith.addf %46, %48 : vector<8x128xf32>
    %cst_39 = arith.constant 0.000000e+00 : f32
    %50 = vector.broadcast %cst_39 : f32 to vector<8x128xf32>
    %51 = arith.maximumf %49, %50 : vector<8x128xf32>
    %c0_40 = arith.constant 0 : index
    %c0_41 = arith.constant 0 : index
    %c2_42 = arith.constant 2 : index
    %52 = vector.load %arg1[%c0_40, %c0_41, %c2_42] : memref<1x4x128xbf16, #tpu.memory_space<vmem>>, vector<1x4x20xbf16>
    %53 = vector.shape_cast %52 : vector<1x4x20xbf16> to vector<4x20xbf16>
    %c0_43 = arith.constant 0 : index
    %c0_44 = arith.constant 0 : index
    %54 = vector.load %arg7[%c0_43, %c0_44] : memref<8x4xbf16, #tpu.memory_space<vmem>>, vector<8x4xbf16>
    %cst_45 = arith.constant dense<0.000000e+00> : vector<8x20xf32>
    %55 = tpu.matmul %54, %53, %cst_45 {dimension_numbers = #tpu.dot_dimension_numbers<[1], [0], [0], [1], [0, 0, 1, 1], [], []>} : vector<8x4xbf16>, vector<4x20xbf16>, vector<8x20xf32> -> vector<8x20xf32>
    %c0_46 = arith.constant 0 : index
    %c0_47 = arith.constant 0 : index
    %56 = vector.load %arg8[%c0_46, %c0_47] : memref<8x1xf32, #tpu.memory_space<vmem>>, vector<8x1xf32>
    %57 = vector.broadcast %56 : vector<8x1xf32> to vector<8x20xf32>
    %58 = arith.addf %55, %57 : vector<8x20xf32>
    %cst_48 = arith.constant 0.000000e+00 : f32
    %59 = vector.broadcast %cst_48 : f32 to vector<8x108xf32>
    %60 = tpu.concatenate %58, %59 in 1 : vector<8x20xf32>, vector<8x108xf32> -> vector<8x128xf32>
    %61 = arith.addf %51, %60 : vector<8x128xf32>
    %cst_49 = arith.constant 0.000000e+00 : f32
    %62 = vector.broadcast %cst_49 : f32 to vector<8x128xf32>
    %63 = arith.maximumf %61, %62 : vector<8x128xf32>
    %c0_50 = arith.constant 0 : index
    %c0_51 = arith.constant 0 : index
    %c0_52 = arith.constant 0 : index
    %64 = vector.load %arg9[%c0_50, %c0_51, %c0_52] : memref<1x8x128xf32, #tpu.memory_space<vmem>>, vector<1x8x128xf32>
    %65 = vector.shape_cast %64 : vector<1x8x128xf32> to vector<8x128xf32>
    %66 = vector.shape_cast %63 : vector<8x128xf32> to vector<1x8x128xf32>
    tpu.vector_store %arg9[%c0_50, %c0_51, %c0_52], %66 {strides = array<i32>} : memref<1x8x128xf32, #tpu.memory_space<vmem>>, vector<1x8x128xf32>,
    return
  }
  func.func @transform_0(%arg0: i32) -> (i32, i32, i32) {
    %c0_i32 = arith.constant 0 : i32
    %c0_i32_0 = arith.constant 0 : i32
    %c0_i32_1 = arith.constant 0 : i32
    return %arg0, %c0_i32, %c0_i32_0 : i32, i32, i32
  }
  func.func @transform_1(%arg0: i32) -> (i32, i32) {
    %c0_i32 = arith.constant 0 : i32
    %c0_i32_0 = arith.constant 0 : i32
    %c0_i32_1 = arith.constant 0 : i32
    return %c0_i32, %c0_i32_0 : i32, i32
  }
  func.func @transform_2(%arg0: i32) -> (i32, i32, i32) {
    %c0_i32 = arith.constant 0 : i32
    %c0_i32_0 = arith.constant 0 : i32
    %c0_i32_1 = arith.constant 0 : i32
    %c0_i32_2 = arith.constant 0 : i32
    return %c0_i32, %c0_i32_0, %c0_i32_1 : i32, i32, i32
  }
  func.func @transform_3(%arg0: i32) -> (i32, i32) {
    %c0_i32 = arith.constant 0 : i32
    %c0_i32_0 = arith.constant 0 : i32
    %c0_i32_1 = arith.constant 0 : i32
    return %c0_i32, %c0_i32_0 : i32, i32
  }
  func.func @transform_4(%arg0: i32) -> (i32, i32, i32) {
    %c0_i32 = arith.constant 0 : i32
    %c0_i32_0 = arith.constant 0 : i32
    %c0_i32_1 = arith.constant 0 : i32
    %c0_i32_2 = arith.constant 0 : i32
    return %c0_i32, %c0_i32_0, %c0_i32_1 : i32, i32, i32
  }
  func.func @transform_5(%arg0: i32) -> (i32, i32) {
    %c0_i32 = arith.constant 0 : i32
    %c0_i32_0 = arith.constant 0 : i32
    %c0_i32_1 = arith.constant 0 : i32
    return %c0_i32, %c0_i32_0 : i32, i32
  }
  func.func @transform_6(%arg0: i32) -> (i32, i32) {
    %c0_i32 = arith.constant 0 : i32
    %c0_i32_0 = arith.constant 0 : i32
    %c0_i32_1 = arith.constant 0 : i32
    return %c0_i32, %c0_i32_0 : i32, i32
  }
  func.func @transform_7(%arg0: i32) -> (i32, i32) {
    %c0_i32 = arith.constant 0 : i32
    %c0_i32_0 = arith.constant 0 : i32
    %c0_i32_1 = arith.constant 0 : i32
    return %c0_i32, %c0_i32_0 : i32, i32
  }
  func.func @transform_8(%arg0: i32) -> (i32, i32, i32) {
    %c0_i32 = arith.constant 0 : i32
    %c0_i32_0 = arith.constant 0 : i32
    %c0_i32_1 = arith.constant 0 : i32
    return %arg0, %c0_i32, %c0_i32_0 : i32, i32, i32
  }
}

</mosaic_0001>

<bundles_post_ra>
// kernel: tpu_custom_call.1
= control target key start
LH: loop header
LB: loop body
LE: loop exit
PB: predicated region body
PF: predicated region fallthrough
CT: control target
= control target key end

     0   :  { %13 = vsyncpa [#allocation3], 0  ;;  %s1193_s0 = inlined_call_operand.vmem [shape: bf16[2,4,128], index: 0, kind: input, shape index: {}]   ;;  %s1194_s1 = inlined_call_operand.vmem [shape: f32[1,20], index: 1, kind: input, shape index: {}]   ;;  %s1195_s2 = inlined_call_operand.vmem [shape: bf16[3,8,4], index: 2, kind: input, shape index: {}]   ;;  %s1196_s3 = inlined_call_operand.vmem [shape: f32[8,1], index: 3, kind: input, shape index: {}]   ;;  %s1197_s4 = inlined_call_operand.vmem [shape: bf16[3,8,8], index: 4, kind: input, shape index: {}]   ;;  %s1198_s5 = inlined_call_operand.vmem [shape: f32[8,1], index: 5, kind: input, shape index: {}]   ;;  %s1199_s6 = inlined_call_operand.vmem [shape: bf16[8,4], index: 6, kind: input, shape index: {}]   ;;  %s1200_s7 = inlined_call_operand.vmem [shape: f32[8,1], index: 7, kind: input, shape index: {}]   ;;  %s1201_s8 = inlined_call_operand.hbm [shape: f32[2,8,128], index: 8, kind: output, shape index: {}]  }
   0x1   :  { %15 = vsyncpa [#allocation3 + $0x1], 0  ;;  %s1033_s27 = smov 0   ;;  %s1035_s28 = smov 0  }
   0x2   :  { %s1037_s29 = smov 0   ;;  %s1039_s30 = smov 0  }
   0x3 LB: > { %s1054_s9 = sadd.s32 4294967295, %s978_s30   ;;  %s792_s10 = sadd.s32 4294967294, %s978_s30   ;;  %s978_s30 = sphi %s1039_s30, %s1207_s30   ;;  %s974_s29 = sphi %s1037_s29, %s1206_s29   ;;  %s970_s28 = sphi %s1035_s28, %s1205_s28   ;;  %s966_s27 = sphi %s1033_s27, %s1204_s27  }
   0x4   : > { %s1058_s11 = sadd.s32 1, %s978_s30   ;;  %s201_s12 = sadd.s32 1, %s974_s29 }
   0x5   : > { %s198_s13 = ssub.s32 %s978_s30, %s1058_s11  ;;  %p211_p0 = scmp.ne.s32.totalorder %s974_s29, %s970_s28 }
   0x6   : > { %p199_p1 = scmp.eq.s32.totalorder %s198_s13, 0  ;;  %p212_p2 = scmp.eq.s32.totalorder %s1054_s9, 1 }
   0x7   : > { %p217_p3 = scmp.ne.s32.totalorder %s970_s28, %s966_s27  ;;  %p218_p4 = scmp.eq.s32.totalorder %s792_s10, 1 }
   0x8   : > { %s1069_s14 = scalar_select %p199_p1, %s974_s29, %s201_s12  }
   0x9   : > { %p1071_p5 = por %p212_p2, %p211_p0  ;;  %p1075_p6 = por %p218_p4, %p217_p3 }
   0xa   : > { %p795_p7 = scmp.ge.s32.totalorder %s978_s30, 1  ;;  %p264_p8 = scmp.lt.s32.totalorder %s978_s30, 3 }
   0xc   : > { %p265_p9 = pnand %p795_p7, %p264_p8 }
   0xd   : > { %p297_p10 = scmp.lt.s32.totalorder (!%p265_p9), %s1054_s9, 1  ;;  %s983_s26 = smov (!%p265_p9), 126  }
   0xe   : > { %268 = sbr.rel (%p265_p9) target bundleno = 818 (0x332), region = 52  ;;  %s985_s10 = smov (!%p265_p9), 124  }
   0xf   : > { %s811_s23 = sshll.u32 (!%p265_p9), %s1054_s9, 7 }
  0x10   : > { %s731_s13 = scalar_lea.hbm (!%p265_p9), %s1201_s8, %s811_s23 }
  0x13   : > { %v310_v0 = vlaneseq  ;;  %v980_v1 = vmov 1983009808   ;;  %v981_v3 = vmov 0.0   ;;  %s298_s17 = scalar_select %p297_p10, %s1054_s9, 1  ;;  %vm982_vm0 = vmmov 0   ;;  %v470_v11 = vld [vmem:[%s1196_s3] sm:$0xff] }
  0x14   : > { %v308_v2 = vunpack.c.l.s4 %v980_v1  ;;  %828 = vmatprep.subr.bf16.mxu0 %v981_v3  ;;  %834 = vmatprep.subr.bf16.mxu1 %v981_v3  ;;  %vm320_vm1 = vcmask 1041408   ;;  %vm316_vm2 = vcmask 31744   ;;  %v303_v10 = vld [vmem:[%s1195_s2] sm:$0xf]  ;;  %v984_v12 = vmov 0  }
  0x15   : > { %v311_v4 = vshrl.u32 %v310_v0, 7  ;;  %830 = vmatprep.mubr.msk.bf16.mxu0 %vm982_vm0, %v981_v3  ;;  %836 = vmatprep.mubr.msk.bf16.mxu1 %vm982_vm0, %v981_v3  ;;  %s797_s18 = sshll.u32 %s298_s17, 1  ;;  %v798_v16 = vld [vmem:[%s1195_s2 + $0x4] sm:$0xf]  ;;  %v801_v19 = vld [vmem:[%s1195_s2 + $0x8] sm:$0xf] }
  0x16   : > { %v309_v5 = vunpack.c.0.s8 %v308_v2  ;;  %s300_s21 = scalar_lea.vmem %s1193_s0, %s797_s18  ;;  %916 = vset.pattern.permute.xlu1 %v984_v12  ;;  %917 = vset.pattern.permute.xlu0 %v984_v12  ;;  %v478_v24 = vld [vmem:[%s1194_s1] sm:$0x1]  ;;  %vm491_vm5 = vcmask 15360   ;;  %vm495_vm6 = vcmask 179200   ;;  %vm512_vm7 = vcmask 1043456   ;;  %s987_s18 = smov [#allocation2]  }
  0x17   : > { %v302_v7 = vld [vmem:[%s300_s21] sm:$0x3]  ;;  %473 = vperm.xlu1 %916, %v470_v11   ;;  %vm479_vm3 = vcmp.gt.f32.partialorder %v478_v24, 0.5  ;;  %v483_v28 = vsub.s32 0, %v311_v4  ;;  %vm508_vm8 = vcmask 64512   ;;  %vm506_vm9 = vcmask 1031168  }
  0x18   : > { %v312_v6 = vsub.s32 %v309_v5, %v311_v4  ;;  %v368_v9 = vsel %vm320_vm1, %v302_v7, 0  ;;  %v802_v13 = vld.sshfl [vmem:[%s300_s21] sm:$0x3 pattern:$0x76325410]  ;;  %v480_v29 = vsel %vm479_vm3, 1, %v984_v12 }
  0x19   : > { %835 = vmatpush3.bf16.msra.mxu1 %v368_v9  ;;  %v484_v34 = vrot.slane %v480_v29, %v483_v28  ;;  %s986_s21 = smov 2   ;;  %v665_v43 = vld [vmem:[%s1200_s7] sm:$0xff]  ;;  %vm607_vm10 = vcmask 1014784   ;;  %v807_v60 = vld [vmem:[%s1197_s4 + $0x8] sm:$0xf]  ;;  %vm714_vm11 = vcmask 162816  }
  0x1a   : > { %v313_v8 = vrot.slane %v302_v7, %v312_v6  ;;  %846 = vmatprep.subr.bf16.mxu1 %v981_v3  ;;  %v497_v48 = vld [vmem:[%s1197_s4] sm:$0xf]  ;;  %v804_v55 = vld [vmem:[%s1197_s4 + $0x4] sm:$0xf]  ;;  %s922_s19 = sshll.u32 %s987_s18, 4  ;;  %s923_s19 = int_to_ptr.vmem [resolvable:$false] %s922_s19 }
  0x1b   : > { %vm485_vm4 = vcmp.eq.s32.totalorder %v484_v34, 1  ;;  %v664_v49 = vld [vmem:[%s1199_s6] sm:$0xf]  ;;  %s924_s9 = scalar_lea.vmem %s923_s19, 256 }
  0x1c   : > { %314 = vrot.lane.b32.xlu0 %v313_v8, %s983_s26  ;;  %837 = vmatmul.mubr.msk.bf16.vlgmr.msra.gmra.mxu1 %vm316_vm2, %v303_v10  ;;  %v656_v50 = vld [vmem:[%s1198_s5] sm:$0xff] }
  0x1d   : > { %848 = vmatprep.mubr.msk.bf16.mxu1 %vm982_vm0, %v981_v3 }
  0x20   : > { %421 = vrot.lane.b32.xlu0 %v802_v13, %s985_s10 }
  0x8e   : > { %v315_v14 = vpop.permute.xlu0 %314 }
  0x8f   : > { %v322_v15 = vsel %vm320_vm1, %v315_v14, 0 }
  0x90   : > { %829 = vmatpush3.bf16.msra.mxu0 %v322_v15 }
  0x91   : > { %840 = vmatprep.subr.bf16.mxu0 %v981_v3 }
  0x92   : > { %v422_v17 = vpop.permute.xlu0 %421  ;;  %v474_v33 = vpop.permute.xlu1 %473 }
  0x93   : > { %831 = vmatmul.mubr.msk.bf16.vlgmr.msra.gmra.mxu0 %vm316_vm2, %v798_v16  ;;  %v427_v18 = vsel %vm320_vm1, %v422_v17, 0 }
  0x94   : > { %841 = vmatpush3.bf16.msra.mxu0 %v427_v18  ;;  %842 = vmatprep.mubr.msk.bf16.mxu0 %vm982_vm0, %v981_v3 }
  0x95   : > { %852 = vmatprep.subr.bf16.mxu0 %v981_v3 }
  0x9b   : > { %843 = vmatmul.mubr.msk.bf16.vlgmr.msra.gmra.mxu0 %vm316_vm2, %v801_v19 }
  0x9c   : > { %854 = vmatprep.mubr.msk.bf16.mxu0 %vm982_vm0, %v981_v3 }
  0xdc   : > { %v404_v20 = vpop.f32.mrf.mxu1 }
  0xde   : > { %v838_v21 = vpop.f32.mrf.mxu1 }
  0xe0   : > { %v407_v22 = vpop.f32.mrf.mxu1 }
  0xe2   : > { %v839_v23 = vpop.f32.mrf.mxu1 }
 0x153   : > { %v358_v25 = vpop.f32.mrf.mxu0 }
 0x154   : > { %v405_v31 = vadd.f32 %v404_v20, %v358_v25 }
 0x155   : > { %v832_v26 = vpop.f32.mrf.mxu0 }
 0x157   : > { %v361_v27 = vpop.f32.mrf.mxu0 }
 0x159   : > { %v833_v30 = vpop.f32.mrf.mxu0 }
 0x15b   : > { %v463_v32 = vpop.f32.mrf.mxu0 }
 0x15c   : > { %v469_v35 = vadd.f32 %v463_v32, %v405_v31 }
 0x15d   : > { %v844_v36 = vpop.f32.mrf.mxu0 }
 0x15e   : > { %v476_v37 = vadd.f32 %v474_v33, %v469_v35 }
 0x15f   : > { %v466_v38 = vpop.f32.mrf.mxu0 }
 0x160   : > { %v477_v39 = vmax.f32 %v476_v37, 0.0 }
 0x161   : > { %v845_v40 = vpop.f32.mrf.mxu0 }
 0x162   : > { %v486_v41 = vsel %vm485_vm4, %v477_v39, 0.0 }
 0x163   : > { %v487_v42 = vpack.c.bf16 %v486_v41, %v486_v41 }
 0x165   : > { %489 = vrot.lane.b32.xlu1 %v487_v42, %s986_s21  ;;  %s294_s21 = sand.u32 1, %s970_s28  }
 0x166   : > { %s796_s22 = sshll.u32 %s294_s21, 3  ;;  %s720_s17 = scalar_lea.sflag [#allocation3], %s294_s21 }
 0x167   : > { %s296_s24 = scalar_lea.vmem [#allocation2], %s796_s22 }
 0x168   : > { %s733_s25 = sshll.u32 %s296_s24, 4  ;;  %s734_s25 = int_to_ptr.vmem [resolvable:$true] %s733_s25 }
 0x169   : > { %504 = vrot.lane.b32.xlu1 %v984_v12, %s983_s26  ;;  %p925_p0 = scmp.lt.s32.totalorder %s734_s25, %s923_s19 }
 0x16d   : > { %605 = vrot.lane.b32.xlu1 %v984_v12, %s985_s10 }
 0x171   : > { %668 = vperm.xlu1 %916, %v665_v43  }
 0x1d7   : > { %v490_v44 = vpop.permute.xlu1 %489 }
 0x1d8   : > { %v494_v45 = vsel %vm491_vm5, 0, %v490_v44 }
 0x1d9   : > { %v496_v46 = vsel %vm495_vm6, %v494_v45, 0 }
 0x1da   : > { %502 = vrot.lane.b32.xlu0 %v496_v46, %s983_s26  ;;  %v559_v47 = vsel %vm512_vm7, %v496_v46, 0 }
 0x1db   : > { %853 = vmatpush3.bf16.msra.mxu0 %v559_v47  ;;  %v505_v51 = vpop.permute.xlu1 %504 }
 0x1dc   : > { %864 = vmatprep.subr.bf16.mxu0 %v981_v3 }
 0x1de   : > { %603 = vrot.lane.b32.xlu0 %v496_v46, %s985_s10  ;;  %855 = vmatmul.mubr.msk.bf16.vlgmr.msra.gmra.mxu0 %vm508_vm8, %v497_v48  ;;  %s918_s10 = scalar_lea.vmem %s734_s25, 128 }
 0x1df   : > { %865 = vmatpush3.bf16.msra.mxu0 %v322_v15  ;;  %866 = vmatprep.mubr.msk.bf16.mxu0 %vm982_vm0, %v981_v3  ;;  %v606_v56 = vpop.permute.xlu1 %605  ;;  %p919_p11 = scmp.ne.s32.totalorder %s734_s25, %s918_s10  ;;  %p926_p1 = scmp.lt.s32.totalorder %s924_s9, %s918_s10 }
 0x1e1   : > { %p920_p12 = pnand %p919_p11, %p1071_p5  ;;  %p927_p2 = por %p926_p1, %p925_p0 }
 0x1e2   : > { %659 = vperm.xlu0 %917, %v656_v50  }
 0x1e3   : > { %p921_p13 = pneg %p920_p12 }
 0x1e5   : > { %p928_p3 = pnand %p927_p2, %p921_p13 }
 0x1e6   : > { %867 = vmatmul.mubr.msk.bf16.vlgmr.msra.gmra.mxu0 %vm316_vm2, %v664_v49 }
 0x1ec   : > { %v669_v12 = vpop.permute.xlu1 %668 }
 0x24c   : > { %v503_v52 = vpop.permute.xlu0 %502 }
 0x24d   : > { %v507_v53 = vsel %vm506_vm9, %v503_v52, %v505_v51 }
 0x24e   : > { %v514_v54 = vsel %vm512_vm7, %v507_v53, 0 }
 0x24f   : > { %847 = vmatpush3.bf16.msra.mxu1 %v514_v54 }
 0x250   : > { %v604_v57 = vpop.permute.xlu0 %603  ;;  %858 = vmatprep.subr.bf16.mxu1 %v981_v3 }
 0x251   : > { %v608_v58 = vsel %vm607_vm10, %v604_v57, %v606_v56 }
 0x252   : > { %v613_v59 = vsel %vm512_vm7, %v608_v58, 0  ;;  %849 = vmatmul.mubr.msk.bf16.vlgmr.msra.gmra.mxu1 %vm508_vm8, %v804_v55 }
 0x253   : > { %859 = vmatpush3.bf16.msra.mxu1 %v613_v59  ;;  %860 = vmatprep.mubr.msk.bf16.mxu1 %vm982_vm0, %v981_v3 }
 0x25a   : > { %861 = vmatmul.mubr.msk.bf16.vlgmr.msra.gmra.mxu1 %vm508_vm8, %v807_v60 }
 0x25d   : > { %v660_v11 = vpop.permute.xlu0 %659 }
 0x29e   : > { %v595_v61 = vpop.f32.mrf.mxu0 }
 0x2a0   : > { %v856_v62 = vpop.f32.mrf.mxu0 }
 0x2a2   : > { %v598_v63 = vpop.f32.mrf.mxu0 }
 0x2a4   : > { %v857_v0 = vpop.f32.mrf.mxu0 }
 0x2a6   : > { %v708_v1 = vpop.f32.mrf.mxu0 }
 0x2a7   : > { %v709_v14 = vadd.f32 %v708_v1, %v669_v12 }
 0x2a8   : > { %v868_v2 = vpop.f32.mrf.mxu0 }
 0x2a9   : > { %v715_v19 = vsel %vm714_vm11, %v709_v14, 0.0 }
 0x2aa   : > { %v711_v4 = vpop.f32.mrf.mxu0 }
 0x2ac   : > { %v869_v5 = vpop.f32.mrf.mxu0 }
 0x312   : > { %v550_v6 = vpop.f32.mrf.mxu1 }
 0x313   : > { %v596_v9 = vadd.f32 %v595_v61, %v550_v6 }
 0x314   : > { %v850_v7 = vpop.f32.mrf.mxu1 }
 0x316   : > { %v553_v8 = vpop.f32.mrf.mxu1 }
 0x318   : > { %v851_v3 = vpop.f32.mrf.mxu1 }
 0x31a   : > { %v649_v10 = vpop.f32.mrf.mxu1 }
 0x31b   : > { %v655_v13 = vadd.f32 %v649_v10, %v596_v9 }
 0x31c   : > { %v862_v15 = vpop.f32.mrf.mxu1 }
 0x31d   : > { %v662_v16 = vadd.f32 %v660_v11, %v655_v13 }
 0x31e   : > { %v652_v17 = vpop.f32.mrf.mxu1 }
 0x31f   : > { %v663_v18 = vmax.f32 %v662_v16, 0.0 }
 0x320   : > { %v863_v20 = vpop.f32.mrf.mxu1 }
 0x321   : > { %v716_v21 = vadd.f32 %v715_v19, %v663_v18 }
 0x323   : > { %v717_v22 = vmax.f32 %v716_v21, 0.0 }
 0x325   : > { %718 = vst [vmem:[%s296_s24] sm:$0xff] %v717_v22 }
 0x326   : > { %931 = shalt.err (!%p928_p3)
}
 0x327   : > { %s932_s20 = scalar_lea.hbm %s731_s13, 128  ;;  %s936_s23 = scalar_lea.hbm %s1201_s8, 256 }
 0x328   : > { %p933_p4 = scmp.ne.s32.totalorder %s731_s13, %s932_s20  ;;  %p937_p9 = scmp.lt.s32.totalorder %s731_s13, %s1201_s8 }
 0x329   : > { %p938_p10 = scmp.lt.s32.totalorder %s936_s23, %s932_s20 }
 0x32a   : > { %p934_p7 = pnand %p933_p4, %p1071_p5 }
 0x32b   : > { %p939_p11 = por %p938_p10, %p937_p9 }
 0x32c   : > { %p935_p8 = pneg %p934_p7 }
 0x32e   : > { %p940_p12 = pnand %p939_p11, %p935_p8 }
 0x330   : > { %943 = shalt.err (!%p940_p12)
}
 0x331   : > { %870 = dma.vmem_to_hbm [thread:$0]  (%p1071_p5), %s734_s25, 128, %s731_s13, %s720_s17  }
 0x332 PF: > { %p876_p13 = scmp.ge.s32.totalorder %s978_s30, 2  ;;  %s745_s26 = sand.u32 1, %s966_s27  }
 0x333   : > { %s746_s10 = scalar_lea.sflag [#allocation3], %s745_s26 }
 0x334   : > { %p873_p0 = pnand %p876_p13, %p1075_p6 }
 0x336   : > { %p874_p1 = pneg %p873_p0 }
 0x338   : > { %961 = dma.done.wait (%p874_p1), %s746_s10, 128  }
 0x339   : > { %963 = vsyncadd (%p874_p1), %s746_s10, 4294967168  ;;  %p18_p2 = scmp.ge.s32.totalorder %s1058_s11, 4   ;;  %s1204_s27 = smov %s970_s28 }
 0x33a   : > { %s1205_s28 = smov %s974_s29  ;;  %s1206_s29 = smov %s1069_s14 }
 0x33b   : > { %s1207_s30 = smov %s1058_s11  ;;  %20 = sbr.rel (!%p18_p2) target bundleno = 3 (0x3), region = 91 }
 0x340   :  { %751 = vsyncpa [#allocation3], 1 }
 0x341   :  { %753 = vsyncpa [#allocation3 + $0x1], 1 }

</bundles_post_ra>
